<compile_context>
chip_gen: v6e
topology: v6e:2x2x1
jax: 0.10.0
libtpu: 0.0.40
codegen_flags: <defaults>
</compile_context>

<pallas_src>
from functools import partial

import jax
import jax.numpy as jnp
from jax.experimental import pallas as pl
from jax.experimental.pallas import tpu as pltpu


def sym_exp(x):
    # Standard symexp: sign(x) * (exp(|x|) - 1)
    return jnp.sign(x) * (jnp.exp(jnp.abs(x)) - 1.0)


def prepare_categorical_head_params(weight, bias, support, compute_dtype=None):
    """One-time packing of the head parameters (hoisted out of the per-call path).

    weight:  (K, D) nn.Linear weight
    bias:    (K,)
    support: (K,)
    Returns (wt, bias_row, support_mask):
      wt           (D, Kp)  W^T cast to compute_dtype, K padded to 128 lanes
      bias_row     (1, Kp)  f32 bias; pad lanes are -1e30 so they vanish in softmax
      support_mask (2, Kp)  f32 rows [support, valid-mask]; used to fuse the
                            softmax numerator & denominator into one MXU pass
    """
    K, D = weight.shape
    if compute_dtype is None:
        compute_dtype = weight.dtype
    Kp = ((K + 127) // 128) * 128
    wt = jnp.zeros((D, Kp), compute_dtype).at[:, :K].set(
        weight.T.astype(compute_dtype))
    bias_row = jnp.full((1, Kp), -1e30, dtype=jnp.float32).at[:, :K].set(
        bias.astype(jnp.float32).reshape(1, K))
    support_mask = jnp.zeros((2, Kp), dtype=jnp.float32)
    support_mask = support_mask.at[0, :K].set(support.astype(jnp.float32))
    support_mask = support_mask.at[1, :K].set(1.0)
    return wt, bias_row, support_mask


def _cat_reg_head_kernel(x_ref, wt_ref, b_ref, sm_ref, o_ref, *, sym_log_normalize):
    # x_ref : (TN, D)   native-dtype batch tile (streamed)
    # wt_ref: (D, Kp)   W^T, resident across the grid
    # b_ref : (1, Kp)   f32 bias (pad lanes -1e30)
    # sm_ref: (2, Kp)   f32 rows [support, valid-mask]
    # o_ref : (1, TN)   f32 expected value per row (lane-dense)
    logits = jnp.dot(x_ref[...], wt_ref[...],
                     preferred_element_type=jnp.float32) + b_ref[...]      # (TN, Kp)
    m = jnp.max(logits, axis=-1, keepdims=True)                            # (TN, 1)
    e = jnp.exp(logits - m)                                                # (TN, Kp)
    # One MXU pass contracting Kp yields [numerator; denominator] already laid
    # out as lane-dense rows: (2, Kp) x (TN, Kp)^T -> (2, TN).
    sums = jax.lax.dot_general(
        sm_ref[...], e,
        dimension_numbers=(((1,), (1,)), ((), ())),
        preferred_element_type=jnp.float32)                                # (2, TN)
    out = sums[0:1, :] / sums[1:2, :]                                      # (1, TN)
    if sym_log_normalize:
        out = jnp.sign(out) * (jnp.exp(jnp.abs(out)) - 1.0)                # sym_exp
    o_ref[...] = out.astype(o_ref.dtype)


def _build_head_call(D, Kp, tn, num_tiles, sym_log_normalize, vmem_limit,
                     single_buffer_params):
    # Grid-invariant inputs can be single-buffered to halve their VMEM cost.
    resident = {"pipeline_mode": pl.Buffered(1)} if single_buffer_params else {}
    return pl.pallas_call(
        partial(_cat_reg_head_kernel, sym_log_normalize=sym_log_normalize),
        out_shape=jax.ShapeDtypeStruct((num_tiles, 1, tn), jnp.float32),
        grid=(num_tiles,),
        in_specs=[
            pl.BlockSpec((tn, D), lambda i: (i, 0)),               # x tile (streamed)
            pl.BlockSpec((D, Kp), lambda i: (0, 0), **resident),   # W^T   (resident)
            pl.BlockSpec((1, Kp), lambda i: (0, 0), **resident),   # bias  (resident)
            pl.BlockSpec((2, Kp), lambda i: (0, 0), **resident),   # support/mask
        ],
        out_specs=pl.BlockSpec((None, 1, tn), lambda i: (i, 0, 0)),  # lane-dense row
        compiler_params=pltpu.CompilerParams(
            dimension_semantics=("parallel",),
            vmem_limit_bytes=vmem_limit,
        ),
    )


def categorical_regression_head_forward(x, wt, bias_row, support_mask, *,
                                        sym_log_normalize=False, block_n=1024):
    """Pallas forward for CategoricalRegressionHead.

    x: (..., D) in its native dtype (bf16 recommended; no upcast is performed).
    wt / bias_row / support_mask: outputs of prepare_categorical_head_params.
    Returns (...,) expected values in float32.
    """
    *lead, D = x.shape
    x2 = x.reshape(-1, D)
    N = x2.shape[0]
    Kp = wt.shape[1]
    assert wt.shape[0] == D

    x_bytes = x2.dtype.itemsize
    # Batch tile: multiple of 8 sublanes, capped by (a) block_n, (b) a ~24 MiB
    # budget for the double-buffered x tiles, and (c) ~N/2 so the grid has at
    # least two steps to feed both v7x TensorCores.
    tn_vmem = max(8, ((24 << 20) // (2 * D * x_bytes)) // 8 * 8)
    tn_split = max(8, (((N + 1) // 2) + 7) // 8 * 8)
    tn = max(8, min(block_n, tn_vmem, tn_split))
    num_tiles = pl.cdiv(N, tn)

    # Explicit scoped-VMEM limit so the bigger tiles are not rejected by the
    # 16/32 MiB defaults (kept <= 64 MiB for v7x's physical VMEM).
    need = (2 * tn * D * x_bytes                 # x tiles (double-buffered)
            + 2 * D * Kp * wt.dtype.itemsize     # resident W^T (worst case 2 bufs)
            + 2 * 3 * Kp * 4                     # bias + support/mask
            + 2 * tn * 4)                        # output rows
    vmem_limit = int(min(64 << 20, max(32 << 20, need + (4 << 20))))
    # TODO(synk): if the resident W^T alone exceeds ~16-24 MiB (very large D*K
    # on v7x), stream it via a K grid axis with online-softmax scratch instead.

    try:
        call = _build_head_call(D, Kp, tn, num_tiles, sym_log_normalize,
                                vmem_limit, single_buffer_params=True)
        out = call(x2, wt, bias_row, support_mask)
    except Exception:  # pl.Buffered(1) unsupported -> default double buffering
        call = _build_head_call(D, Kp, tn, num_tiles, sym_log_normalize,
                                vmem_limit, single_buffer_params=False)
        out = call(x2, wt, bias_row, support_mask)

    flat = out.reshape(-1)[:N]
    return flat.reshape(tuple(lead))


if __name__ == "__main__":
    key = jax.random.PRNGKey(0)
    batch, seq, in_features, out_features = 2, 7, 32, 51   # K=51 exercises lane padding

    k1, k2 = jax.random.split(key)
    weight = 0.05 * jax.random.normal(k1, (out_features, in_features), dtype=jnp.float32)
    x = jax.random.normal(k2, (batch, seq, in_features), dtype=jnp.float32)

    def ref_forward(x, weight, bias, support, sym_log_normalize):
        logits = x.astype(jnp.float32) @ weight.astype(jnp.float32).T + bias
        out = jax.nn.softmax(logits, axis=-1) @ support
        return sym_exp(out) if sym_log_normalize else out

    ok = True
    for sln in (False, True):
        # Parameter construction mirroring CategoricalRegressionHead.__init__
        # (default-support path).
        support = jnp.linspace(-15.0, 15.0, out_features, dtype=jnp.float32)
        if not sln:
            support = sym_exp(support)
        bias = -jnp.abs(support) / (jnp.max(support) / jnp.log(jnp.max(jnp.abs(support))))

        wt, b_row, s_mask = prepare_categorical_head_params(
            weight, bias, support, compute_dtype=x.dtype)
        out = categorical_regression_head_forward(
            x, wt, b_row, s_mask, sym_log_normalize=sln)
        jax.block_until_ready(out)

        ref = ref_forward(x, weight, bias, support, sln)
        ok &= out.shape == (batch, seq)
        ok &= bool(jnp.all(jnp.isfinite(out)))
        ok &= bool(jnp.allclose(out, ref, rtol=5e-3, atol=1e-3))

    # TODO(synk): compute_loss / compute_loss_from_pred (MSE on the expectation)
    # are plain reductions handled at the JAX wrapper level, not in the kernel.
    assert ok
    print("KERNEL_OK")
</pallas_src>

<mosaic_0001>
module attributes {stable_mosaic.version = 11 : i64} {
  func.func @_cat_reg_head_kernel(%arg0: i32, %arg1: memref<8x32xf32, #tpu.memory_space<vmem>>, %arg2: memref<32x128xf32, #tpu.memory_space<vmem>>, %arg3: memref<1x128xf32, #tpu.memory_space<vmem>>, %arg4: memref<2x128xf32, #tpu.memory_space<vmem>>, %arg5: memref<1x1x8xf32, #tpu.memory_space<vmem>>) attributes {dimension_semantics = [#tpu.dimension_semantics<parallel>], iteration_bounds = array<i64: 2>, scalar_prefetch = 0 : i64, scratch_operands = 0 : i64, tpu.core_type = #tpu.core_type<tc>, window_params = [{transform_indices = @transform_0, window_bounds = array<i64: 8, 32>}, {pipeline_mode = #tpu.pipeline_mode<synchronous>, transform_indices = @transform_1, window_bounds = array<i64: 32, 128>}, {pipeline_mode = #tpu.pipeline_mode<synchronous>, transform_indices = @transform_2, window_bounds = array<i64: 1, 128>}, {pipeline_mode = #tpu.pipeline_mode<synchronous>, transform_indices = @transform_3, window_bounds = array<i64: 2, 128>}, {transform_indices = @transform_4, window_bounds = array<i64: 1, 1, 8>}]} {
    %c0 = arith.constant 0 : index
    %c0_0 = arith.constant 0 : index
    %0 = vector.load %arg1[%c0, %c0_0] : memref<8x32xf32, #tpu.memory_space<vmem>>, vector<8x32xf32>
    %c0_1 = arith.constant 0 : index
    %c0_2 = arith.constant 0 : index
    %1 = vector.load %arg2[%c0_1, %c0_2] : memref<32x128xf32, #tpu.memory_space<vmem>>, vector<32x128xf32>
    %cst = arith.constant dense<0.000000e+00> : vector<8x128xf32>
    %2 = tpu.matmul %0, %1, %cst {dimension_numbers = #tpu.dot_dimension_numbers<[1], [0], [0], [1], [0, 0, 1, 1], [], []>} : vector<8x32xf32>, vector<32x128xf32>, vector<8x128xf32> -> vector<8x128xf32>
    %c0_3 = arith.constant 0 : index
    %c0_4 = arith.constant 0 : index
    %3 = vector.load %arg3[%c0_3, %c0_4] : memref<1x128xf32, #tpu.memory_space<vmem>>, vector<1x128xf32>
    %4 = vector.broadcast %3 : vector<1x128xf32> to vector<8x128xf32>
    %5 = arith.addf %2, %4 : vector<8x128xf32>
    %cst_5 = arith.constant dense<0xFF800000> : vector<8xf32>
    %6 = vector.multi_reduction <maximumf>, %5, %cst_5 [1] : vector<8x128xf32> to vector<8xf32>
    %7 = vector.shape_cast %6 : vector<8xf32> to vector<8x1xf32>
    %8 = vector.broadcast %7 : vector<8x1xf32> to vector<8x128xf32>
    %9 = arith.subf %5, %8 : vector<8x128xf32>
    %10 = math.exp %9 : vector<8x128xf32>
    %c0_6 = arith.constant 0 : index
    %c0_7 = arith.constant 0 : index
    %11 = vector.load %arg4[%c0_6, %c0_7] : memref<2x128xf32, #tpu.memory_space<vmem>>, vector<2x128xf32>
    %cst_8 = arith.constant dense<0.000000e+00> : vector<2x8xf32>
    %12 = tpu.matmul %11, %10, %cst_8 {dimension_numbers = #tpu.dot_dimension_numbers<[1], [1], [0], [0], [0, 0, 1, 0], [], []>} : vector<2x128xf32>, vector<8x128xf32>, vector<2x8xf32> -> vector<2x8xf32>
    %13 = vector.extract_strided_slice %12 {offsets = [0, 0], sizes = [1, 8], strides = [1, 1]} : vector<2x8xf32> to vector<1x8xf32>
    %14 = vector.extract_strided_slice %12 {offsets = [1, 0], sizes = [1, 8], strides = [1, 1]} : vector<2x8xf32> to vector<1x8xf32>
    %15 = arith.divf %13, %14 : vector<1x8xf32>
    %c0_9 = arith.constant 0 : index
    %c0_10 = arith.constant 0 : index
    %c0_11 = arith.constant 0 : index
    %16 = vector.load %arg5[%c0_9, %c0_10, %c0_11] : memref<1x1x8xf32, #tpu.memory_space<vmem>>, vector<1x1x8xf32>
    %17 = vector.shape_cast %16 : vector<1x1x8xf32> to vector<1x8xf32>
    %18 = vector.shape_cast %15 : vector<1x8xf32> to vector<1x1x8xf32>
    tpu.vector_store %arg5[%c0_9, %c0_10, %c0_11], %18 {strides = array<i32>} : memref<1x1x8xf32, #tpu.memory_space<vmem>>, vector<1x1x8xf32>,
    return
  }
  func.func @transform_0(%arg0: i32) -> (i32, i32) {
    %c0_i32 = arith.constant 0 : i32
    %c0_i32_0 = arith.constant 0 : i32
    return %arg0, %c0_i32 : i32, i32
  }
  func.func @transform_1(%arg0: i32) -> (i32, i32) {
    %c0_i32 = arith.constant 0 : i32
    %c0_i32_0 = arith.constant 0 : i32
    %c0_i32_1 = arith.constant 0 : i32
    return %c0_i32, %c0_i32_0 : i32, i32
  }
  func.func @transform_2(%arg0: i32) -> (i32, i32) {
    %c0_i32 = arith.constant 0 : i32
    %c0_i32_0 = arith.constant 0 : i32
    %c0_i32_1 = arith.constant 0 : i32
    return %c0_i32, %c0_i32_0 : i32, i32
  }
  func.func @transform_3(%arg0: i32) -> (i32, i32) {
    %c0_i32 = arith.constant 0 : i32
    %c0_i32_0 = arith.constant 0 : i32
    %c0_i32_1 = arith.constant 0 : i32
    return %c0_i32, %c0_i32_0 : i32, i32
  }
  func.func @transform_4(%arg0: i32) -> (i32, i32, i32) {
    %c0_i32 = arith.constant 0 : i32
    %c0_i32_0 = arith.constant 0 : i32
    %c0_i32_1 = arith.constant 0 : i32
    return %arg0, %c0_i32, %c0_i32_0 : i32, i32, i32
  }
}

module attributes {stable_mosaic.version = 11 : i64} {
  func.func @_cat_reg_head_kernel(%arg0: i32, %arg1: memref<8x32xf32, #tpu.memory_space<vmem>>, %arg2: memref<32x128xf32, #tpu.memory_space<vmem>>, %arg3: memref<1x128xf32, #tpu.memory_space<vmem>>, %arg4: memref<2x128xf32, #tpu.memory_space<vmem>>, %arg5: memref<1x1x8xf32, #tpu.memory_space<vmem>>) attributes {dimension_semantics = [#tpu.dimension_semantics<parallel>], iteration_bounds = array<i64: 2>, scalar_prefetch = 0 : i64, scratch_operands = 0 : i64, tpu.core_type = #tpu.core_type<tc>, window_params = [{transform_indices = @transform_0, window_bounds = array<i64: 8, 32>}, {pipeline_mode = #tpu.pipeline_mode<synchronous>, transform_indices = @transform_1, window_bounds = array<i64: 32, 128>}, {pipeline_mode = #tpu.pipeline_mode<synchronous>, transform_indices = @transform_2, window_bounds = array<i64: 1, 128>}, {pipeline_mode = #tpu.pipeline_mode<synchronous>, transform_indices = @transform_3, window_bounds = array<i64: 2, 128>}, {transform_indices = @transform_4, window_bounds = array<i64: 1, 1, 8>}]} {
    %c0 = arith.constant 0 : index
    %c0_0 = arith.constant 0 : index
    %0 = vector.load %arg1[%c0, %c0_0] : memref<8x32xf32, #tpu.memory_space<vmem>>, vector<8x32xf32>
    %c0_1 = arith.constant 0 : index
    %c0_2 = arith.constant 0 : index
    %1 = vector.load %arg2[%c0_1, %c0_2] : memref<32x128xf32, #tpu.memory_space<vmem>>, vector<32x128xf32>
    %cst = arith.constant dense<0.000000e+00> : vector<8x128xf32>
    %2 = tpu.matmul %0, %1, %cst {dimension_numbers = #tpu.dot_dimension_numbers<[1], [0], [0], [1], [0, 0, 1, 1], [], []>} : vector<8x32xf32>, vector<32x128xf32>, vector<8x128xf32> -> vector<8x128xf32>
    %c0_3 = arith.constant 0 : index
    %c0_4 = arith.constant 0 : index
    %3 = vector.load %arg3[%c0_3, %c0_4] : memref<1x128xf32, #tpu.memory_space<vmem>>, vector<1x128xf32>
    %4 = vector.broadcast %3 : vector<1x128xf32> to vector<8x128xf32>
    %5 = arith.addf %2, %4 : vector<8x128xf32>
    %cst_5 = arith.constant dense<0xFF800000> : vector<8xf32>
    %6 = vector.multi_reduction <maximumf>, %5, %cst_5 [1] : vector<8x128xf32> to vector<8xf32>
    %7 = vector.shape_cast %6 : vector<8xf32> to vector<8x1xf32>
    %8 = vector.broadcast %7 : vector<8x1xf32> to vector<8x128xf32>
    %9 = arith.subf %5, %8 : vector<8x128xf32>
    %10 = math.exp %9 : vector<8x128xf32>
    %c0_6 = arith.constant 0 : index
    %c0_7 = arith.constant 0 : index
    %11 = vector.load %arg4[%c0_6, %c0_7] : memref<2x128xf32, #tpu.memory_space<vmem>>, vector<2x128xf32>
    %cst_8 = arith.constant dense<0.000000e+00> : vector<2x8xf32>
    %12 = tpu.matmul %11, %10, %cst_8 {dimension_numbers = #tpu.dot_dimension_numbers<[1], [1], [0], [0], [0, 0, 1, 0], [], []>} : vector<2x128xf32>, vector<8x128xf32>, vector<2x8xf32> -> vector<2x8xf32>
    %13 = vector.extract_strided_slice %12 {offsets = [0, 0], sizes = [1, 8], strides = [1, 1]} : vector<2x8xf32> to vector<1x8xf32>
    %14 = vector.extract_strided_slice %12 {offsets = [1, 0], sizes = [1, 8], strides = [1, 1]} : vector<2x8xf32> to vector<1x8xf32>
    %15 = arith.divf %13, %14 : vector<1x8xf32>
    %c0_9 = arith.constant 0 : index
    %c0_10 = arith.constant 0 : index
    %c0_11 = arith.constant 0 : index
    %16 = vector.load %arg5[%c0_9, %c0_10, %c0_11] : memref<1x1x8xf32, #tpu.memory_space<vmem>>, vector<1x1x8xf32>
    %17 = vector.shape_cast %16 : vector<1x1x8xf32> to vector<1x8xf32>
    %18 = vector.shape_cast %15 : vector<1x8xf32> to vector<1x1x8xf32>
    tpu.vector_store %arg5[%c0_9, %c0_10, %c0_11], %18 {strides = array<i32>} : memref<1x1x8xf32, #tpu.memory_space<vmem>>, vector<1x1x8xf32>,
    return
  }
  func.func @transform_0(%arg0: i32) -> (i32, i32) {
    %c0_i32 = arith.constant 0 : i32
    %c0_i32_0 = arith.constant 0 : i32
    return %arg0, %c0_i32 : i32, i32
  }
  func.func @transform_1(%arg0: i32) -> (i32, i32) {
    %c0_i32 = arith.constant 0 : i32
    %c0_i32_0 = arith.constant 0 : i32
    %c0_i32_1 = arith.constant 0 : i32
    return %c0_i32, %c0_i32_0 : i32, i32
  }
  func.func @transform_2(%arg0: i32) -> (i32, i32) {
    %c0_i32 = arith.constant 0 : i32
    %c0_i32_0 = arith.constant 0 : i32
    %c0_i32_1 = arith.constant 0 : i32
    return %c0_i32, %c0_i32_0 : i32, i32
  }
  func.func @transform_3(%arg0: i32) -> (i32, i32) {
    %c0_i32 = arith.constant 0 : i32
    %c0_i32_0 = arith.constant 0 : i32
    %c0_i32_1 = arith.constant 0 : i32
    return %c0_i32, %c0_i32_0 : i32, i32
  }
  func.func @transform_4(%arg0: i32) -> (i32, i32, i32) {
    %c0_i32 = arith.constant 0 : i32
    %c0_i32_0 = arith.constant 0 : i32
    %c0_i32_1 = arith.constant 0 : i32
    return %arg0, %c0_i32, %c0_i32_0 : i32, i32, i32
  }
}

</mosaic_0001>

<bundles_post_ra>
// kernel: tpu_custom_call.1
= control target key start
LH: loop header
LB: loop body
LE: loop exit
PB: predicated region body
PF: predicated region fallthrough
CT: control target
= control target key end

     0   :  { %9 = vsyncpa [#allocation3], 0  ;;  %s904_s0 = inlined_call_operand.hbm [shape: f32[14,32], index: 0, kind: input, shape index: {}]   ;;  %s905_s1 = inlined_call_operand.hbm [shape: f32[32,128], index: 1, kind: input, shape index: {}]   ;;  %s906_s2 = inlined_call_operand.vmem [shape: f32[1,128], index: 2, kind: input, shape index: {}]   ;;  %s907_s3 = inlined_call_operand.vmem [shape: f32[2,128], index: 3, kind: input, shape index: {}]   ;;  %s908_s4 = inlined_call_operand.hbm [shape: f32[2,1,8], index: 4, kind: output, shape index: {}]  }
   0x1   :  { %11 = vsyncpa [#allocation3 + $0x1], 0 }
   0x2   :  { %12 = vsyncpa [#allocation6], 0 }
   0x3   :  { %13 = vsyncpa [#allocation4], 0 }
   0x4   :  { %15 = vsyncpa [#allocation4 + $0x1], 0  ;;  %s743_s15 = smov 0   ;;  %s745_s16 = smov 0  }
   0x5   :  { %s747_s17 = smov 0   ;;  %s749_s18 = smov 0  }
   0x6 LB: > { %s764_s19 = sadd.s32 4294967295, %s709_s18   ;;  %s485_s20 = sadd.s32 4294967294, %s709_s18   ;;  %s709_s18 = sphi %s749_s18, %s930_s18   ;;  %s705_s17 = sphi %s747_s17, %s929_s17   ;;  %s701_s16 = sphi %s745_s16, %s928_s16   ;;  %s697_s15 = sphi %s743_s15, %s927_s15  }
   0x7   : > { %p41_p0 = scmp.ne.s32.totalorder %s701_s16, %s697_s15  ;;  %p909_p1 = scmp.eq.s32.totalorder %s764_s19, 0 }
   0x8   : > { %p134_p3 = scmp.eq.s32.totalorder %s485_s20, 1  ;;  %p486_p5 = scmp.ge.s32.totalorder %s709_s18, 1 }
   0x9   : > { %p773_p4 = por %p909_p1, %p41_p0  ;;  %p141_p7 = scmp.lt.s32.totalorder %s709_s18, 3 }
   0xa   : > { %p778_p6 = por %p134_p3, %p41_p0  ;;  %s711_s24 = smov [#allocation5]  }
   0xb   : > { %s913_s21 = scalar_select %p773_p4, 1, 0 }
   0xc   : > { %s914_s22 = scalar_select %p778_p6, 1, 0 }
   0xd   : > { %p783_p8 = pnand %p486_p5, %p141_p7  ;;  %s153_s25 = sshll.u32 %s711_s24, 4  ;;  %s154_s25 = int_to_ptr.vmem [resolvable:$true] %s153_s25 }
   0xe   : > { %s797_s27 = sadd.s32 1, %s709_s18   ;;  %s28_s28 = sadd.s32 1, %s705_s17 }
   0xf   : > { %s915_s23 = scalar_select %p783_p8, 1, 0 }
  0x10   : > { %p530_p9 = pneg %p783_p8  ;;  %s25_s29 = ssub.s32 %s709_s18, %s797_s27 }
  0x11   : > { %s598_s30 = scalar_lea.vmem %s154_s25, 512  ;;  %p606_p5 = scmp.lt.s32.totalorder %s154_s25, %s154_s25 }
  0x12   : > { %p792_p11 = pnand %p530_p9, %p909_p1  ;;  %p599_p13 = scmp.ne.s32.totalorder %s154_s25, %s598_s30 }
  0x13   : > { %p607_p7 = scmp.lt.s32.totalorder %s598_s30, %s598_s30 }
  0x14   : > { %p589_p12 = pneg %p792_p11 }
  0x15   : > { %p608_p10 = por %p607_p7, %p606_p5 }
  0x16   : > { %p601_p0 = pnand %p599_p13, %p589_p12 }
  0x18   : > { %p602_p3 = pneg %p601_p0 }
  0x1a   : > { %p609_p2 = pnand %p608_p10, %p602_p3 }
  0x1c   : > { %612 = shalt.err (!%p609_p2)
}
  0x1d   : > { %s712_s5 = smov 128   ;;  %s713_s6 = smov 8  }
  0x1e   : > { %533 = dma.hbm_to_vmem [thread:$0]  (!%p792_p11), %s905_s1, 512, %s154_s25, [#allocation6], %s712_s5, %s712_s5, %s713_s6  }
  0x1f   : > { %p26_p9 = scmp.eq.s32.totalorder %s25_s29, 0  ;;  %p35_p12 = scmp.ne.s32.totalorder %s705_s17, %s701_s16 }
  0x20   : > { %p36_p10 = scmp.eq.s32.totalorder %s709_s18, 0  ;;  %p543_p2 = scmp.lt.s32.totalorder %s709_s18, 2 }
  0x21   : > { %s814_s9 = scalar_select %p26_p9, %s705_s17, %s28_s28  }
  0x22   : > { %p37_p13 = por %p36_p10, %p35_p12  ;;  %p917_p0 = scmp.eq.s32.totalorder %s764_s19, 1 }
  0x23   : > { %s173_s11 = sand.u32 1, %s705_s17   ;;  %s490_s12 = sshll.u32 %s709_s18, 7 }
  0x24   : > { %p818_p3 = por %p917_p0, %p35_p12  ;;  %s489_s13 = sshll.u32 %s173_s11, 3 }
  0x25   : > { %s827_s24 = scalar_lea.hbm %s904_s0, %s490_s12  ;;  %s177_s25 = scalar_lea.vmem [#allocation2], %s489_s13 }
  0x26   : > { %s918_s10 = scalar_select %p818_p3, 1, 0 }
  0x27   : > { %s184_s26 = sshll.u32 %s177_s25, 4  ;;  %p829_p11 = pnand %p543_p2, %p37_p13  ;;  %s185_s26 = int_to_ptr.vmem [resolvable:$true] %s184_s26 }
  0x28   : > { %s174_s29 = scalar_lea.sflag [#allocation3], %s173_s11  ;;  %s613_s30 = scalar_lea.hbm %s827_s24, 128 }
  0x29   : > { %p614_p5 = scmp.ne.s32.totalorder %s827_s24, %s613_s30  ;;  %p615_p7 = pneg %p829_p11 }
  0x2a   : > { %s618_s7 = scalar_lea.hbm %s904_s0, 256  ;;  %p619_p10 = scmp.lt.s32.totalorder %s827_s24, %s904_s0 }
  0x2b   : > { %p616_p9 = pnand %p615_p7, %p614_p5  ;;  %p620_p2 = scmp.lt.s32.totalorder %s618_s7, %s613_s30 }
  0x2d   : > { %p617_p12 = pneg %p616_p9  ;;  %p621_p13 = por %p620_p2, %p619_p10 }
  0x2f   : > { %p622_p0 = pnand %p621_p13, %p617_p12 }
  0x31   : > { %625 = shalt.err (!%p622_p0)
}
  0x32   : > { %s626_s13 = scalar_lea.vmem %s185_s26, 128  ;;  %s714_s11 = smov [#allocation2]  }
  0x33   : > { %p627_p1 = scmp.ne.s32.totalorder %s185_s26, %s626_s13  ;;  %s631_s14 = sshll.u32 %s714_s11, 4  ;;  %s632_s14 = int_to_ptr.vmem [resolvable:$false] %s631_s14 }
  0x34   : > { %s633_s20 = scalar_lea.vmem %s632_s14, 256  ;;  %p634_p5 = scmp.lt.s32.totalorder %s185_s26, %s632_s14 }
  0x35   : > { %p629_p6 = pnand %p627_p1, %p615_p7  ;;  %p635_p9 = scmp.lt.s32.totalorder %s633_s20, %s626_s13 }
  0x37   : > { %p630_p3 = pneg %p629_p6  ;;  %p636_p4 = por %p635_p9, %p634_p5 }
  0x39   : > { %p637_p8 = pnand %p636_p4, %p630_p3 }
  0x3b   : > { %640 = shalt.err (!%p637_p8)
}
  0x3c   : > { %537 = dma.hbm_to_vmem [thread:$0]  (!%p829_p11), %s827_s24, 128, %s185_s26, %s174_s29  }
  0x3d   : > { %p920_p12 = scmp.ne.s32.totalorder %s915_s23, 0 }
  0x3e   : > { %s850_s25 = sand.u32 (!%p920_p12), 1, %s701_s16   ;;  %p921_p1 = scmp.ne.s32.totalorder (!%p920_p12), %s913_s21, 0 }
  0x3f   : > { %193 = sbr.rel (%p920_p12) target bundleno = 660 (0x294), region = 36  ;;  %s492_s30 = sshll.u32 (!%p920_p12), %s850_s25, 3 }
  0x40   : > { %s196_s5 = scalar_lea.sflag (!%p920_p12), [#allocation3], %s850_s25  ;;  %s199_s6 = scalar_lea.vmem (!%p920_p12), [#allocation2], %s492_s30 }
  0x44   : > { %684 = dma.done.wait (%p921_p1), %s196_s5, 128  }
  0x45   : > { %686 = vsyncadd (%p921_p1), %s196_s5, 4294967168  ;;  %p922_p4 = scmp.eq.s32.totalorder %s764_s19, 0 }
  0x47   : > { %688 = dma.done.wait (%p922_p4), [#allocation6], 512   ;;  %p923_p6 = pmov %p922_p4 }
  0x48   : > { %v715_v0 = vmov 0.0   ;;  %vm716_vm0 = vmmov 0   ;;  %v231_v1 = vld [vmem:[#allocation5 + $0x18] sm:$0xff]  ;;  %v230_v2 = vld [vmem:[#allocation5 + $0x10] sm:$0xff]  ;;  %v229_v3 = vld [vmem:[#allocation5 + $0x8] sm:$0xff]  ;;  %vm239_vm1 = vcmask 261120  }
  0x49   : > { %690 = vsyncadd (%p923_p6), [#allocation6], 4294966784  ;;  %506 = vmatprep.subr.mxu0 %v715_v0  ;;  %514 = vmatprep.mubr.msk.f32.mxu0 %vm716_vm0, %v715_v0  ;;  %v228_v4 = vld [vmem:[#allocation5] sm:$0xff]  ;;  %v227_v5 = vld [vmem:[%s199_s6] sm:$0xff]  ;;  %s496_s28 = sshll.u32 %s764_s19, 4  ;;  %s226_s29 = scalar_lea.vmem [#allocation7], %s850_s25 }
  0x4a   : > { %517 = vmatprep.subr.mxu1 %v715_v0  ;;  %519 = vmatprep.mubr.msk.f32.mxu1 %vm716_vm0, %v715_v0  ;;  %v494_v6 = vld [vmem:[%s906_s2] ss:$0 sm:$0xff]  ;;  %s409_s7 = sshll.u32 %s226_s29, 4  ;;  %vm394_vm2 = vcmask 57344   ;;  %s407_s13 = scalar_lea.hbm %s908_s4, %s496_s28  ;;  %s410_s7 = int_to_ptr.vmem [resolvable:$true] %s409_s7 }
  0x4b   : > { %507 = vmatpush3.msra.mxu0 %v231_v1  ;;  %v318_v14 = vld [vmem:[%s907_s3] sm:$0x3]  ;;  %s397_s11 = scalar_lea.sflag [#allocation4], %s850_s25  ;;  %s641_s14 = scalar_lea.vmem %s410_s7, 16 }
  0x4c   : > { %508 = vmatprep.subr.mxu0 %v715_v0  ;;  %p642_p8 = scmp.ne.s32.totalorder %s410_s7, %s641_s14  ;;  %p924_p3 = scmp.ne.s32.totalorder %s918_s10, 0 }
  0x4d   : > { %509 = vmatpush3.msra.mxu0 %v230_v2  ;;  %s717_s20 = smov [#allocation7]  }
  0x4e   : > { %510 = vmatprep.subr.mxu0 %v715_v0  ;;  %p643_p11 = pnand %p642_p8, %p924_p3  ;;  %s645_s30 = sshll.u32 %s717_s20, 4  ;;  %s646_s30 = int_to_ptr.vmem [resolvable:$false] %s645_s30 }
  0x4f   : > { %511 = vmatpush3.msra.mxu0 %v229_v3  ;;  %s647_s19 = scalar_lea.vmem %s646_s30, 32  ;;  %p648_p10 = scmp.lt.s32.totalorder %s410_s7, %s646_s30 }
  0x50   : > { %512 = vmatprep.subr.mxu0 %v715_v0  ;;  %p644_p7 = pneg %p643_p11  ;;  %p649_p2 = scmp.lt.s32.totalorder %s647_s19, %s641_s14 }
  0x51   : > { %513 = vmatpush3.msra.mxu0 %v228_v4 }
  0x52   : > { %515 = vmatmul.mubr.msk.f32.vlgmr.msra.gmra.mxu0 %vm239_vm1, %v227_v5  ;;  %p650_p13 = por %p649_p2, %p648_p10 }
  0x54   : > { %p651_p0 = pnand %p650_p13, %p644_p7 }
 0x112   : > { %v309_v7 = vpop.f32.mrf.mxu0 }
 0x113   : > { %v310_v8 = vadd.f32 %v494_v6, %v309_v7 }
 0x114   : > { %v516_v9 = vpop.f32.mrf.mxu0 }
 0x115   : > { %313 = vmax.xlane.f32.xlu0 %v310_v8 }
 0x19e   : > { %v314_v10 = vpop.xlane.xlu0 %313 }
 0x19f   : > { %v315_v11 = vsub.f32 %v310_v8, %v314_v10 }
 0x1a1   : > { %v316_v12 = vmul.f32 1.442695, %v315_v11 }
 0x1a3   : > { %583 = vpow2.f32 %v316_v12 }
 0x1b0   : > { %v584_v13 = vpop.eup %583 }
 0x1b1   : > { %518 = vmatpush3.xpose.msra.mxu1 %v584_v13 }
 0x1b4   : > { %520 = vmatmul.mubr.f32.vlgmr.msra.gmra.mxu1 %v318_v14 }
 0x274   : > { %v385_v15 = vpop.f32.mrf.mxu1 }
 0x275   : > { %v390_v16 = vrot.slane %v385_v15, 1 }
 0x276   : > { %v521_v17 = vpop.f32.mrf.mxu1 }
 0x277   : > { %585 = vrcp.f32 %v390_v16 }
 0x284   : > { %v586_v18 = vpop.eup %585 }
 0x285   : > { %v393_v19 = vmul.f32 %v586_v18, %v385_v15 }
 0x287   : > { %395 = vst.msk [vmem:[%s226_s29] sm:$0x1] %vm394_vm2, %v393_v19 }
 0x288   : > { %654 = shalt.err (!%p651_p0)
}
 0x289   : > { %s655_s5 = scalar_lea.hbm %s407_s13, 16  ;;  %s659_s21 = scalar_lea.hbm %s908_s4, 32 }
 0x28a   : > { %p656_p5 = scmp.ne.s32.totalorder %s407_s13, %s655_s5  ;;  %p660_p1 = scmp.lt.s32.totalorder %s407_s13, %s908_s4 }
 0x28b   : > { %p661_p4 = scmp.lt.s32.totalorder %s659_s21, %s655_s5 }
 0x28c   : > { %p657_p9 = pnand %p656_p5, %p924_p3 }
 0x28d   : > { %p662_p6 = por %p661_p4, %p660_p1 }
 0x28e   : > { %p658_p12 = pneg %p657_p9 }
 0x290   : > { %p663_p8 = pnand %p662_p6, %p658_p12 }
 0x292   : > { %666 = shalt.err (!%p663_p8)
}
 0x293   : > { %528 = dma.vmem_to_hbm [thread:$0]  (%p924_p3), %s410_s7, 16, %s407_s13, %s397_s11  }
 0x294 PF: > { %s421_s26 = sand.u32 1, %s697_s15   ;;  %p925_p11 = scmp.ne.s32.totalorder %s914_s22, 0 }
 0x295   : > { %p926_p7 = scmp.ge.s32.totalorder %s709_s18, 2  ;;  %s422_s28 = scalar_lea.sflag [#allocation4], %s421_s26 }
 0x297   : > { %p539_p10 = pnand %p926_p7, %p925_p11 }
 0x299   : > { %p540_p2 = pneg %p539_p10 }
 0x29b   : > { %692 = dma.done.wait (%p540_p2), %s422_s28, 16  }
 0x29c   : > { %694 = vsyncadd (%p540_p2), %s422_s28, 4294967280  ;;  %p18_p13 = scmp.ge.s32.totalorder %s797_s27, 4   ;;  %s927_s15 = smov %s701_s16 }
 0x29d   : > { %s928_s16 = smov %s705_s17  ;;  %s929_s17 = smov %s814_s9 }
 0x29e   : > { %s930_s18 = smov %s797_s27  ;;  %20 = sbr.rel (!%p18_p13) target bundleno = 6 (0x6), region = 85 }
 0x2a3   :  { %426 = vsyncpa [#allocation3], 1 }
 0x2a4   :  { %428 = vsyncpa [#allocation3 + $0x1], 1 }
 0x2a5   :  { %429 = vsyncpa [#allocation6], 1 }
 0x2a6   :  { %430 = vsyncpa [#allocation4], 1 }
 0x2a7   :  { %432 = vsyncpa [#allocation4 + $0x1], 1 }

// kernel: tpu_custom_call.1
= control target key start
LH: loop header
LB: loop body
LE: loop exit
PB: predicated region body
PF: predicated region fallthrough
CT: control target
= control target key end

     0   :  { %9 = vsyncpa [#allocation3], 0  ;;  %s904_s0 = inlined_call_operand.hbm [shape: f32[14,32], index: 0, kind: input, shape index: {}]   ;;  %s905_s1 = inlined_call_operand.hbm [shape: f32[32,128], index: 1, kind: input, shape index: {}]   ;;  %s906_s2 = inlined_call_operand.vmem [shape: f32[1,128], index: 2, kind: input, shape index: {}]   ;;  %s907_s3 = inlined_call_operand.vmem [shape: f32[2,128], index: 3, kind: input, shape index: {}]   ;;  %s908_s4 = inlined_call_operand.hbm [shape: f32[2,1,8], index: 4, kind: output, shape index: {}]  }
   0x1   :  { %11 = vsyncpa [#allocation3 + $0x1], 0 }
   0x2   :  { %12 = vsyncpa [#allocation6], 0 }
   0x3   :  { %13 = vsyncpa [#allocation4], 0 }
   0x4   :  { %15 = vsyncpa [#allocation4 + $0x1], 0  ;;  %s743_s15 = smov 0   ;;  %s745_s16 = smov 0  }
   0x5   :  { %s747_s17 = smov 0   ;;  %s749_s18 = smov 0  }
   0x6 LB: > { %s764_s19 = sadd.s32 4294967295, %s709_s18   ;;  %s485_s20 = sadd.s32 4294967294, %s709_s18   ;;  %s709_s18 = sphi %s749_s18, %s930_s18   ;;  %s705_s17 = sphi %s747_s17, %s929_s17   ;;  %s701_s16 = sphi %s745_s16, %s928_s16   ;;  %s697_s15 = sphi %s743_s15, %s927_s15  }
   0x7   : > { %p41_p0 = scmp.ne.s32.totalorder %s701_s16, %s697_s15  ;;  %p909_p1 = scmp.eq.s32.totalorder %s764_s19, 0 }
   0x8   : > { %p134_p3 = scmp.eq.s32.totalorder %s485_s20, 1  ;;  %p486_p5 = scmp.ge.s32.totalorder %s709_s18, 1 }
   0x9   : > { %p773_p4 = por %p909_p1, %p41_p0  ;;  %p141_p7 = scmp.lt.s32.totalorder %s709_s18, 3 }
   0xa   : > { %p778_p6 = por %p134_p3, %p41_p0  ;;  %s711_s24 = smov [#allocation5]  }
   0xb   : > { %s913_s21 = scalar_select %p773_p4, 1, 0 }
   0xc   : > { %s914_s22 = scalar_select %p778_p6, 1, 0 }
   0xd   : > { %p783_p8 = pnand %p486_p5, %p141_p7  ;;  %s153_s25 = sshll.u32 %s711_s24, 4  ;;  %s154_s25 = int_to_ptr.vmem [resolvable:$true] %s153_s25 }
   0xe   : > { %s797_s27 = sadd.s32 1, %s709_s18   ;;  %s28_s28 = sadd.s32 1, %s705_s17 }
   0xf   : > { %s915_s23 = scalar_select %p783_p8, 1, 0 }
  0x10   : > { %p530_p9 = pneg %p783_p8  ;;  %s25_s29 = ssub.s32 %s709_s18, %s797_s27 }
  0x11   : > { %s598_s30 = scalar_lea.vmem %s154_s25, 512  ;;  %p606_p5 = scmp.lt.s32.totalorder %s154_s25, %s154_s25 }
  0x12   : > { %p792_p11 = pnand %p530_p9, %p909_p1  ;;  %p599_p13 = scmp.ne.s32.totalorder %s154_s25, %s598_s30 }
  0x13   : > { %p607_p7 = scmp.lt.s32.totalorder %s598_s30, %s598_s30 }
  0x14   : > { %p589_p12 = pneg %p792_p11 }
  0x15   : > { %p608_p10 = por %p607_p7, %p606_p5 }
  0x16   : > { %p601_p0 = pnand %p599_p13, %p589_p12 }
  0x18   : > { %p602_p3 = pneg %p601_p0 }
  0x1a   : > { %p609_p2 = pnand %p608_p10, %p602_p3 }
  0x1c   : > { %612 = shalt.err (!%p609_p2)
}
  0x1d   : > { %s712_s5 = smov 128   ;;  %s713_s6 = smov 8  }
  0x1e   : > { %533 = dma.hbm_to_vmem [thread:$0]  (!%p792_p11), %s905_s1, 512, %s154_s25, [#allocation6], %s712_s5, %s712_s5, %s713_s6  }
  0x1f   : > { %p26_p9 = scmp.eq.s32.totalorder %s25_s29, 0  ;;  %p35_p12 = scmp.ne.s32.totalorder %s705_s17, %s701_s16 }
  0x20   : > { %p36_p10 = scmp.eq.s32.totalorder %s709_s18, 0  ;;  %p543_p2 = scmp.lt.s32.totalorder %s709_s18, 2 }
  0x21   : > { %s814_s9 = scalar_select %p26_p9, %s705_s17, %s28_s28  }
  0x22   : > { %p37_p13 = por %p36_p10, %p35_p12  ;;  %p917_p0 = scmp.eq.s32.totalorder %s764_s19, 1 }
  0x23   : > { %s173_s11 = sand.u32 1, %s705_s17   ;;  %s490_s12 = sshll.u32 %s709_s18, 7 }
  0x24   : > { %p818_p3 = por %p917_p0, %p35_p12  ;;  %s489_s13 = sshll.u32 %s173_s11, 3 }
  0x25   : > { %s827_s24 = scalar_lea.hbm %s904_s0, %s490_s12  ;;  %s177_s25 = scalar_lea.vmem [#allocation2], %s489_s13 }
  0x26   : > { %s918_s10 = scalar_select %p818_p3, 1, 0 }
  0x27   : > { %s184_s26 = sshll.u32 %s177_s25, 4  ;;  %p829_p11 = pnand %p543_p2, %p37_p13  ;;  %s185_s26 = int_to_ptr.vmem [resolvable:$true] %s184_s26 }
  0x28   : > { %s174_s29 = scalar_lea.sflag [#allocation3], %s173_s11  ;;  %s613_s30 = scalar_lea.hbm %s827_s24, 128 }
  0x29   : > { %p614_p5 = scmp.ne.s32.totalorder %s827_s24, %s613_s30  ;;  %p615_p7 = pneg %p829_p11 }
  0x2a   : > { %s618_s7 = scalar_lea.hbm %s904_s0, 256  ;;  %p619_p10 = scmp.lt.s32.totalorder %s827_s24, %s904_s0 }
  0x2b   : > { %p616_p9 = pnand %p615_p7, %p614_p5  ;;  %p620_p2 = scmp.lt.s32.totalorder %s618_s7, %s613_s30 }
  0x2d   : > { %p617_p12 = pneg %p616_p9  ;;  %p621_p13 = por %p620_p2, %p619_p10 }
  0x2f   : > { %p622_p0 = pnand %p621_p13, %p617_p12 }
  0x31   : > { %625 = shalt.err (!%p622_p0)
}
  0x32   : > { %s626_s13 = scalar_lea.vmem %s185_s26, 128  ;;  %s714_s11 = smov [#allocation2]  }
  0x33   : > { %p627_p1 = scmp.ne.s32.totalorder %s185_s26, %s626_s13  ;;  %s631_s14 = sshll.u32 %s714_s11, 4  ;;  %s632_s14 = int_to_ptr.vmem [resolvable:$false] %s631_s14 }
  0x34   : > { %s633_s20 = scalar_lea.vmem %s632_s14, 256  ;;  %p634_p5 = scmp.lt.s32.totalorder %s185_s26, %s632_s14 }
  0x35   : > { %p629_p6 = pnand %p627_p1, %p615_p7  ;;  %p635_p9 = scmp.lt.s32.totalorder %s633_s20, %s626_s13 }
  0x37   : > { %p630_p3 = pneg %p629_p6  ;;  %p636_p4 = por %p635_p9, %p634_p5 }
  0x39   : > { %p637_p8 = pnand %p636_p4, %p630_p3 }
  0x3b   : > { %640 = shalt.err (!%p637_p8)
}
  0x3c   : > { %537 = dma.hbm_to_vmem [thread:$0]  (!%p829_p11), %s827_s24, 128, %s185_s26, %s174_s29  }
  0x3d   : > { %p920_p12 = scmp.ne.s32.totalorder %s915_s23, 0 }
  0x3e   : > { %s850_s25 = sand.u32 (!%p920_p12), 1, %s701_s16   ;;  %p921_p1 = scmp.ne.s32.totalorder (!%p920_p12), %s913_s21, 0 }
  0x3f   : > { %193 = sbr.rel (%p920_p12) target bundleno = 660 (0x294), region = 36  ;;  %s492_s30 = sshll.u32 (!%p920_p12), %s850_s25, 3 }
  0x40   : > { %s196_s5 = scalar_lea.sflag (!%p920_p12), [#allocation3], %s850_s25  ;;  %s199_s6 = scalar_lea.vmem (!%p920_p12), [#allocation2], %s492_s30 }
  0x44   : > { %684 = dma.done.wait (%p921_p1), %s196_s5, 128  }
  0x45   : > { %686 = vsyncadd (%p921_p1), %s196_s5, 4294967168  ;;  %p922_p4 = scmp.eq.s32.totalorder %s764_s19, 0 }
  0x47   : > { %688 = dma.done.wait (%p922_p4), [#allocation6], 512   ;;  %p923_p6 = pmov %p922_p4 }
  0x48   : > { %v715_v0 = vmov 0.0   ;;  %vm716_vm0 = vmmov 0   ;;  %v231_v1 = vld [vmem:[#allocation5 + $0x18] sm:$0xff]  ;;  %v230_v2 = vld [vmem:[#allocation5 + $0x10] sm:$0xff]  ;;  %v229_v3 = vld [vmem:[#allocation5 + $0x8] sm:$0xff]  ;;  %vm239_vm1 = vcmask 261120  }
  0x49   : > { %690 = vsyncadd (%p923_p6), [#allocation6], 4294966784  ;;  %506 = vmatprep.subr.mxu0 %v715_v0  ;;  %514 = vmatprep.mubr.msk.f32.mxu0 %vm716_vm0, %v715_v0  ;;  %v228_v4 = vld [vmem:[#allocation5] sm:$0xff]  ;;  %v227_v5 = vld [vmem:[%s199_s6] sm:$0xff]  ;;  %s496_s28 = sshll.u32 %s764_s19, 4  ;;  %s226_s29 = scalar_lea.vmem [#allocation7], %s850_s25 }
  0x4a   : > { %517 = vmatprep.subr.mxu1 %v715_v0  ;;  %519 = vmatprep.mubr.msk.f32.mxu1 %vm716_vm0, %v715_v0  ;;  %v494_v6 = vld [vmem:[%s906_s2] ss:$0 sm:$0xff]  ;;  %s409_s7 = sshll.u32 %s226_s29, 4  ;;  %vm394_vm2 = vcmask 57344   ;;  %s407_s13 = scalar_lea.hbm %s908_s4, %s496_s28  ;;  %s410_s7 = int_to_ptr.vmem [resolvable:$true] %s409_s7 }
  0x4b   : > { %507 = vmatpush3.msra.mxu0 %v231_v1  ;;  %v318_v14 = vld [vmem:[%s907_s3] sm:$0x3]  ;;  %s397_s11 = scalar_lea.sflag [#allocation4], %s850_s25  ;;  %s641_s14 = scalar_lea.vmem %s410_s7, 16 }
  0x4c   : > { %508 = vmatprep.subr.mxu0 %v715_v0  ;;  %p642_p8 = scmp.ne.s32.totalorder %s410_s7, %s641_s14  ;;  %p924_p3 = scmp.ne.s32.totalorder %s918_s10, 0 }
  0x4d   : > { %509 = vmatpush3.msra.mxu0 %v230_v2  ;;  %s717_s20 = smov [#allocation7]  }
  0x4e   : > { %510 = vmatprep.subr.mxu0 %v715_v0  ;;  %p643_p11 = pnand %p642_p8, %p924_p3  ;;  %s645_s30 = sshll.u32 %s717_s20, 4  ;;  %s646_s30 = int_to_ptr.vmem [resolvable:$false] %s645_s30 }
  0x4f   : > { %511 = vmatpush3.msra.mxu0 %v229_v3  ;;  %s647_s19 = scalar_lea.vmem %s646_s30, 32  ;;  %p648_p10 = scmp.lt.s32.totalorder %s410_s7, %s646_s30 }
  0x50   : > { %512 = vmatprep.subr.mxu0 %v715_v0  ;;  %p644_p7 = pneg %p643_p11  ;;  %p649_p2 = scmp.lt.s32.totalorder %s647_s19, %s641_s14 }
  0x51   : > { %513 = vmatpush3.msra.mxu0 %v228_v4 }
  0x52   : > { %515 = vmatmul.mubr.msk.f32.vlgmr.msra.gmra.mxu0 %vm239_vm1, %v227_v5  ;;  %p650_p13 = por %p649_p2, %p648_p10 }
  0x54   : > { %p651_p0 = pnand %p650_p13, %p644_p7 }
 0x112   : > { %v309_v7 = vpop.f32.mrf.mxu0 }
 0x113   : > { %v310_v8 = vadd.f32 %v494_v6, %v309_v7 }
 0x114   : > { %v516_v9 = vpop.f32.mrf.mxu0 }
 0x115   : > { %313 = vmax.xlane.f32.xlu0 %v310_v8 }
 0x19e   : > { %v314_v10 = vpop.xlane.xlu0 %313 }
 0x19f   : > { %v315_v11 = vsub.f32 %v310_v8, %v314_v10 }
 0x1a1   : > { %v316_v12 = vmul.f32 1.442695, %v315_v11 }
 0x1a3   : > { %583 = vpow2.f32 %v316_v12 }
 0x1b0   : > { %v584_v13 = vpop.eup %583 }
 0x1b1   : > { %518 = vmatpush3.xpose.msra.mxu1 %v584_v13 }
 0x1b4   : > { %520 = vmatmul.mubr.f32.vlgmr.msra.gmra.mxu1 %v318_v14 }
 0x274   : > { %v385_v15 = vpop.f32.mrf.mxu1 }
 0x275   : > { %v390_v16 = vrot.slane %v385_v15, 1 }
 0x276   : > { %v521_v17 = vpop.f32.mrf.mxu1 }
 0x277   : > { %585 = vrcp.f32 %v390_v16 }
 0x284   : > { %v586_v18 = vpop.eup %585 }
 0x285   : > { %v393_v19 = vmul.f32 %v586_v18, %v385_v15 }
 0x287   : > { %395 = vst.msk [vmem:[%s226_s29] sm:$0x1] %vm394_vm2, %v393_v19 }
 0x288   : > { %654 = shalt.err (!%p651_p0)
}
 0x289   : > { %s655_s5 = scalar_lea.hbm %s407_s13, 16  ;;  %s659_s21 = scalar_lea.hbm %s908_s4, 32 }
 0x28a   : > { %p656_p5 = scmp.ne.s32.totalorder %s407_s13, %s655_s5  ;;  %p660_p1 = scmp.lt.s32.totalorder %s407_s13, %s908_s4 }
 0x28b   : > { %p661_p4 = scmp.lt.s32.totalorder %s659_s21, %s655_s5 }
 0x28c   : > { %p657_p9 = pnand %p656_p5, %p924_p3 }
 0x28d   : > { %p662_p6 = por %p661_p4, %p660_p1 }
 0x28e   : > { %p658_p12 = pneg %p657_p9 }
 0x290   : > { %p663_p8 = pnand %p662_p6, %p658_p12 }
 0x292   : > { %666 = shalt.err (!%p663_p8)
}
 0x293   : > { %528 = dma.vmem_to_hbm [thread:$0]  (%p924_p3), %s410_s7, 16, %s407_s13, %s397_s11  }
 0x294 PF: > { %s421_s26 = sand.u32 1, %s697_s15   ;;  %p925_p11 = scmp.ne.s32.totalorder %s914_s22, 0 }
 0x295   : > { %p926_p7 = scmp.ge.s32.totalorder %s709_s18, 2  ;;  %s422_s28 = scalar_lea.sflag [#allocation4], %s421_s26 }
 0x297   : > { %p539_p10 = pnand %p926_p7, %p925_p11 }
 0x299   : > { %p540_p2 = pneg %p539_p10 }
 0x29b   : > { %692 = dma.done.wait (%p540_p2), %s422_s28, 16  }
 0x29c   : > { %694 = vsyncadd (%p540_p2), %s422_s28, 4294967280  ;;  %p18_p13 = scmp.ge.s32.totalorder %s797_s27, 4   ;;  %s927_s15 = smov %s701_s16 }
 0x29d   : > { %s928_s16 = smov %s705_s17  ;;  %s929_s17 = smov %s814_s9 }
 0x29e   : > { %s930_s18 = smov %s797_s27  ;;  %20 = sbr.rel (!%p18_p13) target bundleno = 6 (0x6), region = 85 }
 0x2a3   :  { %426 = vsyncpa [#allocation3], 1 }
 0x2a4   :  { %428 = vsyncpa [#allocation3 + $0x1], 1 }
 0x2a5   :  { %429 = vsyncpa [#allocation6], 1 }
 0x2a6   :  { %430 = vsyncpa [#allocation4], 1 }
 0x2a7   :  { %432 = vsyncpa [#allocation4 + $0x1], 1 }

</bundles_post_ra>
